<compile_context>
chip_gen: v7x
topology: tpu7x:2x2x1
jax: 0.10.0
libtpu: 0.0.40
codegen_flags: <defaults>
</compile_context>

<pallas_src>
import jax
import jax.numpy as jnp
from jax.experimental import pallas as pl
from jax.experimental.pallas import tpu as pltpu

FEATURE_DIM = 768
H1 = 384
H2 = 192
NUM_CLASSES = 12

# Lane-dense padded sizes (multiples of 128) so every matmul and the final
# store are unmasked full-lane ops.
H2_PAD = 256
OUT_PAD = 128

# Below this many rows per half, splitting the batch into >=2 grid steps (for
# v7x dual-TC) just adds per-step overhead.
_MIN_ROWS_PER_SPLIT = 256


def _round_up(x, m):
    return ((x + m - 1) // m) * m


def _mlp_kernel(x_ref, w1_ref, b1_ref, w2_ref, b2_ref, w3_ref, b3_ref, o_ref):
    # In-kernel bf16 cast of the activation tile (saves a wrapper-side HBM
    # pass over x).  All matmuls accumulate in f32 on the MXU.
    x = x_ref[...].astype(jnp.bfloat16)

    # Layer 1: Linear(768->384) + ReLU.
    h1 = jnp.dot(x, w1_ref[...], preferred_element_type=jnp.float32)
    h1 = jnp.maximum(h1 + b1_ref[...], 0.0)
    # Dropout(0.5) -> identity (eval mode).

    # Layer 2: Linear(384->192, padded to 256 lanes) + ReLU.
    # Padded columns of W2/b2 are exactly zero -> padded h2 lanes stay 0.
    h2 = jnp.dot(h1.astype(jnp.bfloat16), w2_ref[...],
                 preferred_element_type=jnp.float32)
    h2 = jnp.maximum(h2 + b2_ref[...], 0.0)
    # Dropout(0.5) -> identity (eval mode).

    # Layer 3: Linear(192->12, padded to 128 lanes).  Real logits in cols [:12].
    logits = jnp.dot(h2.astype(jnp.bfloat16), w3_ref[...],
                     preferred_element_type=jnp.float32)
    o_ref[...] = (logits + b3_ref[...]).astype(o_ref.dtype)


def prepare_params(params):
    """One-time parameter preparation (hoisted out of the per-call path):
    zero-pad the narrow layers to lane-dense widths and cast weights to bf16.
    Biases stay f32 (added after the f32 accumulation)."""
    w1, b1, w2, b2, w3, b3 = params
    w2p = jnp.pad(w2, ((0, 0), (0, H2_PAD - H2)))
    b2p = jnp.pad(b2, ((0, 0), (0, H2_PAD - H2)))
    w3p = jnp.pad(w3, ((0, H2_PAD - H2), (0, OUT_PAD - NUM_CLASSES)))
    b3p = jnp.pad(b3, ((0, 0), (0, OUT_PAD - NUM_CLASSES)))
    return (w1.astype(jnp.bfloat16), b1,
            w2p.astype(jnp.bfloat16), b2p,
            w3p.astype(jnp.bfloat16), b3p)


def label_classifier_forward(x, prepared_params, *, block_b=2048,
                             slice_output=True):
    """x: (B, FEATURE_DIM) float32 -> (B, NUM_CLASSES) float32 logits.

    With slice_output=False, returns the lane-dense (B, OUT_PAD) buffer
    (columns [NUM_CLASSES:] are exactly zero) to avoid an extra memory pass
    when the consumer is fused downstream.
    """
    w1, b1, w2, b2, w3, b3 = prepared_params
    B, F = x.shape
    assert F == FEATURE_DIM

    # Batch tile: a multiple of 8 sublanes, capped by block_b.  No padding of
    # x -- the partial last tile's output writes are masked by Pallas.
    blk = min(block_b, _round_up(B, 8))
    # Guarantee >= 2 grid steps when there is enough work, so the "parallel"
    # batch axis shards across both TensorCores on v7x.
    if pl.cdiv(B, blk) < 2 and B >= 2 * _MIN_ROWS_PER_SPLIT:
        blk = _round_up(pl.cdiv(B, 2), 8)
    grid = (pl.cdiv(B, blk),)

    flops = 2 * B * (FEATURE_DIM * H1 + H1 * H2_PAD + H2_PAD * OUT_PAD)
    bytes_accessed = (
        B * FEATURE_DIM * 4                                          # x (f32)
        + (FEATURE_DIM * H1 + H1 * H2_PAD + H2_PAD * OUT_PAD) * 2    # weights (bf16)
        + (H1 + H2_PAD + OUT_PAD) * 4                                # biases (f32)
        + B * OUT_PAD * 4                                            # logits (f32)
    )

    out = pl.pallas_call(
        _mlp_kernel,
        out_shape=jax.ShapeDtypeStruct((B, OUT_PAD), jnp.float32),
        grid_spec=pltpu.PrefetchScalarGridSpec(
            num_scalar_prefetch=0,
            grid=grid,
            in_specs=[
                pl.BlockSpec((blk, FEATURE_DIM), lambda i: (i, 0)),   # x tile
                # Weights/biases: constant index_map -> fetched once, kept
                # resident across all grid steps.
                pl.BlockSpec((FEATURE_DIM, H1), lambda i: (0, 0)),    # W1
                pl.BlockSpec((1, H1), lambda i: (0, 0)),              # b1
                pl.BlockSpec((H1, H2_PAD), lambda i: (0, 0)),         # W2 (padded)
                pl.BlockSpec((1, H2_PAD), lambda i: (0, 0)),          # b2 (padded)
                pl.BlockSpec((H2_PAD, OUT_PAD), lambda i: (0, 0)),    # W3 (padded)
                pl.BlockSpec((1, OUT_PAD), lambda i: (0, 0)),         # b3 (padded)
            ],
            out_specs=pl.BlockSpec((blk, OUT_PAD), lambda i: (i, 0)),
        ),
        compiler_params=pltpu.CompilerParams(
            dimension_semantics=("parallel",),
            # blk=2048 needs ~20-25 MiB (f32 x double buffer dominates).
            # Raise the scoped limit so the big tile works on v5e (16 MiB
            # default) while staying well under v7x's 64 MiB physical per TC.
            vmem_limit_bytes=40 * 1024 * 1024,
        ),
        cost_estimate=pl.CostEstimate(
            flops=flops, transcendentals=0, bytes_accessed=bytes_accessed),
    )(x, w1, b1, w2, b2, w3, b3)

    if slice_output:
        return out[:, :NUM_CLASSES]
    return out


def init_params(key):
    """Deterministic synthetic parameter init (uniform, like torch default scale)."""
    ks = jax.random.split(key, 6)

    def lin(kw, kb, fan_in, fan_out):
        bound = 1.0 / jnp.sqrt(fan_in)
        w = jax.random.uniform(kw, (fan_in, fan_out), jnp.float32, -bound, bound)
        b = jax.random.uniform(kb, (1, fan_out), jnp.float32, -bound, bound)
        return w, b

    w1, b1 = lin(ks[0], ks[1], FEATURE_DIM, H1)
    w2, b2 = lin(ks[2], ks[3], H1, H2)
    w3, b3 = lin(ks[4], ks[5], H2, NUM_CLASSES)
    return (w1, b1, w2, b2, w3, b3)


def _reference(x, params):
    """Pure-JAX reference mimicking the kernel's bf16 operand rounding."""
    w1, b1, w2, b2, w3, b3 = params

    def q(a):  # bf16 operand rounding, f32 math
        return a.astype(jnp.bfloat16).astype(jnp.float32)

    h = jnp.maximum(q(x) @ q(w1) + b1, 0.0)
    h = jnp.maximum(q(h) @ q(w2) + b2, 0.0)
    return q(h) @ q(w3) + b3


if __name__ == "__main__":
    key = jax.random.PRNGKey(0)
    k_param, k_x = jax.random.split(key)
    params = init_params(k_param)
    prepared = prepare_params(params)   # one-time weight prep (hoisted)

    ok = True
    for B in (8, 12):  # B=12 exercises the partial-last-tile path
        x = jax.random.normal(jax.random.fold_in(k_x, B), (B, FEATURE_DIM),
                              jnp.float32)
        out = label_classifier_forward(x, prepared)
        out = jax.block_until_ready(out)
        ref = _reference(x, params)
        ok &= out.shape == (B, NUM_CLASSES)
        ok &= bool(jnp.allclose(out, ref, atol=5e-3, rtol=5e-3))

    assert ok
    print("KERNEL_OK")
</pallas_src>

<mosaic_0001>
module attributes {stable_mosaic.version = 11 : i64} {
  func.func @_mlp_kernel(%arg0: i32, %arg1: memref<8x768xf32, #tpu.memory_space<vmem>>, %arg2: memref<768x384xbf16, #tpu.memory_space<vmem>>, %arg3: memref<1x384xf32, #tpu.memory_space<vmem>>, %arg4: memref<384x256xbf16, #tpu.memory_space<vmem>>, %arg5: memref<1x256xf32, #tpu.memory_space<vmem>>, %arg6: memref<256x128xbf16, #tpu.memory_space<vmem>>, %arg7: memref<1x128xf32, #tpu.memory_space<vmem>>, %arg8: memref<8x128xf32, #tpu.memory_space<vmem>>) attributes {dimension_semantics = [#tpu.dimension_semantics<parallel>], iteration_bounds = array<i64: 1>, scalar_prefetch = 0 : i64, scratch_operands = 0 : i64, tpu.core_type = #tpu.core_type<tc>, window_params = [{transform_indices = @transform_0, window_bounds = array<i64: 8, 768>}, {pipeline_mode = #tpu.pipeline_mode<synchronous>, transform_indices = @transform_1, window_bounds = array<i64: 768, 384>}, {pipeline_mode = #tpu.pipeline_mode<synchronous>, transform_indices = @transform_2, window_bounds = array<i64: 1, 384>}, {pipeline_mode = #tpu.pipeline_mode<synchronous>, transform_indices = @transform_3, window_bounds = array<i64: 384, 256>}, {pipeline_mode = #tpu.pipeline_mode<synchronous>, transform_indices = @transform_4, window_bounds = array<i64: 1, 256>}, {pipeline_mode = #tpu.pipeline_mode<synchronous>, transform_indices = @transform_5, window_bounds = array<i64: 256, 128>}, {pipeline_mode = #tpu.pipeline_mode<synchronous>, transform_indices = @transform_6, window_bounds = array<i64: 1, 128>}, {transform_indices = @transform_7, window_bounds = array<i64: 8, 128>}]} {
    %c0 = arith.constant 0 : index
    %c0_0 = arith.constant 0 : index
    %0 = vector.load %arg1[%c0, %c0_0] : memref<8x768xf32, #tpu.memory_space<vmem>>, vector<8x768xf32>
    %1 = arith.truncf %0 : vector<8x768xf32> to vector<8x768xbf16>
    %c0_1 = arith.constant 0 : index
    %c0_2 = arith.constant 0 : index
    %2 = vector.load %arg2[%c0_1, %c0_2] : memref<768x384xbf16, #tpu.memory_space<vmem>>, vector<768x384xbf16>
    %cst = arith.constant dense<0.000000e+00> : vector<8x384xf32>
    %3 = tpu.matmul %1, %2, %cst {dimension_numbers = #tpu.dot_dimension_numbers<[1], [0], [0], [1], [0, 0, 1, 1], [], []>} : vector<8x768xbf16>, vector<768x384xbf16>, vector<8x384xf32> -> vector<8x384xf32>
    %c0_3 = arith.constant 0 : index
    %c0_4 = arith.constant 0 : index
    %4 = vector.load %arg3[%c0_3, %c0_4] : memref<1x384xf32, #tpu.memory_space<vmem>>, vector<1x384xf32>
    %5 = vector.broadcast %4 : vector<1x384xf32> to vector<8x384xf32>
    %6 = arith.addf %3, %5 : vector<8x384xf32>
    %cst_5 = arith.constant 0.000000e+00 : f32
    %7 = vector.broadcast %cst_5 : f32 to vector<8x384xf32>
    %8 = arith.maximumf %6, %7 : vector<8x384xf32>
    %9 = arith.truncf %8 : vector<8x384xf32> to vector<8x384xbf16>
    %c0_6 = arith.constant 0 : index
    %c0_7 = arith.constant 0 : index
    %10 = vector.load %arg4[%c0_6, %c0_7] : memref<384x256xbf16, #tpu.memory_space<vmem>>, vector<384x256xbf16>
    %cst_8 = arith.constant dense<0.000000e+00> : vector<8x256xf32>
    %11 = tpu.matmul %9, %10, %cst_8 {dimension_numbers = #tpu.dot_dimension_numbers<[1], [0], [0], [1], [0, 0, 1, 1], [], []>} : vector<8x384xbf16>, vector<384x256xbf16>, vector<8x256xf32> -> vector<8x256xf32>
    %c0_9 = arith.constant 0 : index
    %c0_10 = arith.constant 0 : index
    %12 = vector.load %arg5[%c0_9, %c0_10] : memref<1x256xf32, #tpu.memory_space<vmem>>, vector<1x256xf32>
    %13 = vector.broadcast %12 : vector<1x256xf32> to vector<8x256xf32>
    %14 = arith.addf %11, %13 : vector<8x256xf32>
    %cst_11 = arith.constant 0.000000e+00 : f32
    %15 = vector.broadcast %cst_11 : f32 to vector<8x256xf32>
    %16 = arith.maximumf %14, %15 : vector<8x256xf32>
    %17 = arith.truncf %16 : vector<8x256xf32> to vector<8x256xbf16>
    %c0_12 = arith.constant 0 : index
    %c0_13 = arith.constant 0 : index
    %18 = vector.load %arg6[%c0_12, %c0_13] : memref<256x128xbf16, #tpu.memory_space<vmem>>, vector<256x128xbf16>
    %cst_14 = arith.constant dense<0.000000e+00> : vector<8x128xf32>
    %19 = tpu.matmul %17, %18, %cst_14 {dimension_numbers = #tpu.dot_dimension_numbers<[1], [0], [0], [1], [0, 0, 1, 1], [], []>} : vector<8x256xbf16>, vector<256x128xbf16>, vector<8x128xf32> -> vector<8x128xf32>
    %c0_15 = arith.constant 0 : index
    %c0_16 = arith.constant 0 : index
    %20 = vector.load %arg7[%c0_15, %c0_16] : memref<1x128xf32, #tpu.memory_space<vmem>>, vector<1x128xf32>
    %21 = vector.broadcast %20 : vector<1x128xf32> to vector<8x128xf32>
    %22 = arith.addf %19, %21 : vector<8x128xf32>
    %c0_17 = arith.constant 0 : index
    %c0_18 = arith.constant 0 : index
    %23 = vector.load %arg8[%c0_17, %c0_18] : memref<8x128xf32, #tpu.memory_space<vmem>>, vector<8x128xf32>
    tpu.vector_store %arg8[%c0_17, %c0_18], %22 {strides = array<i32>} : memref<8x128xf32, #tpu.memory_space<vmem>>, vector<8x128xf32>,
    return
  }
  func.func @transform_0(%arg0: i32) -> (i32, i32) {
    %c0_i32 = arith.constant 0 : i32
    %c0_i32_0 = arith.constant 0 : i32
    return %arg0, %c0_i32 : i32, i32
  }
  func.func @transform_1(%arg0: i32) -> (i32, i32) {
    %c0_i32 = arith.constant 0 : i32
    %c0_i32_0 = arith.constant 0 : i32
    %c0_i32_1 = arith.constant 0 : i32
    return %c0_i32, %c0_i32_0 : i32, i32
  }
  func.func @transform_2(%arg0: i32) -> (i32, i32) {
    %c0_i32 = arith.constant 0 : i32
    %c0_i32_0 = arith.constant 0 : i32
    %c0_i32_1 = arith.constant 0 : i32
    return %c0_i32, %c0_i32_0 : i32, i32
  }
  func.func @transform_3(%arg0: i32) -> (i32, i32) {
    %c0_i32 = arith.constant 0 : i32
    %c0_i32_0 = arith.constant 0 : i32
    %c0_i32_1 = arith.constant 0 : i32
    return %c0_i32, %c0_i32_0 : i32, i32
  }
  func.func @transform_4(%arg0: i32) -> (i32, i32) {
    %c0_i32 = arith.constant 0 : i32
    %c0_i32_0 = arith.constant 0 : i32
    %c0_i32_1 = arith.constant 0 : i32
    return %c0_i32, %c0_i32_0 : i32, i32
  }
  func.func @transform_5(%arg0: i32) -> (i32, i32) {
    %c0_i32 = arith.constant 0 : i32
    %c0_i32_0 = arith.constant 0 : i32
    %c0_i32_1 = arith.constant 0 : i32
    return %c0_i32, %c0_i32_0 : i32, i32
  }
  func.func @transform_6(%arg0: i32) -> (i32, i32) {
    %c0_i32 = arith.constant 0 : i32
    %c0_i32_0 = arith.constant 0 : i32
    %c0_i32_1 = arith.constant 0 : i32
    return %c0_i32, %c0_i32_0 : i32, i32
  }
  func.func @transform_7(%arg0: i32) -> (i32, i32) {
    %c0_i32 = arith.constant 0 : i32
    %c0_i32_0 = arith.constant 0 : i32
    return %arg0, %c0_i32 : i32, i32
  }
}

</mosaic_0001>

<bundles_post_ra>
// kernel: tpu_custom_call.1
= control target key start
LH: loop header
LB: loop body
LE: loop exit
PB: predicated region body
PF: predicated region fallthrough
CT: control target
= control target key end

     0   :  { %12 = vsyncpa [#allocation3], 0  ;;  %s2755_s0 = inlined_call_operand.hbm [shape: f32[8,768], index: 0, kind: input, shape index: {}]   ;;  %s2756_s1 = inlined_call_operand.hbm [shape: bf16[768,384], index: 1, kind: input, shape index: {}]   ;;  %s2757_s2 = inlined_call_operand.vmem [shape: f32[1,384], index: 2, kind: input, shape index: {}]   ;;  %s2758_s3 = inlined_call_operand.hbm [shape: bf16[384,256], index: 3, kind: input, shape index: {}]   ;;  %s2759_s4 = inlined_call_operand.vmem [shape: f32[1,256], index: 4, kind: input, shape index: {}]   ;;  %s2760_s5 = inlined_call_operand.hbm [shape: bf16[256,128], index: 5, kind: input, shape index: {}]   ;;  %s2761_s6 = inlined_call_operand.vmem [shape: f32[1,128], index: 6, kind: input, shape index: {}]   ;;  %s2762_s7 = inlined_call_operand.hbm [shape: f32[8,128], index: 7, kind: output, shape index: {}]  }
   0x1   :  { %13 = vsyncpa [#allocation6], 0 }
   0x2   :  { %14 = vsyncpa [#allocation9], 0 }
   0x3   :  { %15 = vsyncpa [#allocation4], 0  ;;  %s2621_s24 = smov [#allocation5]   ;;  %s2503_s28 = scalar_lea.hbm %s2756_s1, 18432 }
   0x4   :  { %s31_s25 = sshll.u32 %s2621_s24, 4  ;;  %p2504_p0 = scmp.ne.s32.totalorder %s2756_s1, %s2503_s28  ;;  %s32_s25 = int_to_ptr.vmem [resolvable:$true] %s31_s25 }
   0x5   :  { %p2507_p1 = scmp.lt.u32.totalorder %s2503_s28, %s2756_s1 }
   0x7   :  { %p2509_p2 = pnand %p2507_p1, %p2504_p0 }
   0x9   :  { %2512 = shalt.err (!%p2509_p2)
}
   0xa   :  { %s2513_s10 = scalar_lea.vmem %s32_s25, 18432  ;;  %p2518_p4 = scmp.lt.s32.totalorder %s32_s25, %s32_s25 }
   0xb   :  { %p2514_p3 = scmp.ne.s32.totalorder %s32_s25, %s2513_s10  ;;  %p2519_p5 = scmp.lt.s32.totalorder %s2513_s10, %s2513_s10 }
   0xd   :  { %p2520_p6 = por %p2519_p5, %p2518_p4 }
   0xf   :  { %p2521_p7 = pnand %p2520_p6, %p2514_p3 }
  0x11   :  { %2524 = shalt.err (!%p2521_p7)
}
  0x12   :  { %s2622_s11 = smov 192   ;;  %s2623_s12 = smov 12  }
  0x13   :  { %37 = dma.hbm_to_vmem [thread:$0]  %s2756_s1, 18432, %s32_s25, [#allocation6], %s2622_s11, %s2622_s11, %s2623_s12  }
  0x14   :  { %s2624_s15 = smov [#allocation2]   ;;  %s2625_s17 = smov [#allocation7]  }
  0x15   :  { %s22_s16 = sshll.u32 %s2624_s15, 4  ;;  %s45_s18 = sshll.u32 %s2625_s17, 4  ;;  %s23_s16 = int_to_ptr.vmem [resolvable:$true] %s22_s16  ;;  %s46_s18 = int_to_ptr.vmem [resolvable:$true] %s45_s18 }
  0x16   :  { %s2525_s21 = scalar_lea.hbm %s2755_s0, 768 }
  0x17   :  { %p2526_p8 = scmp.ne.s32.totalorder %s2755_s0, %s2525_s21  ;;  %p2529_p9 = scmp.lt.u32.totalorder %s2525_s21, %s2755_s0 }
  0x19   :  { %p2531_p10 = pnand %p2529_p9, %p2526_p8 }
  0x1b   :  { %2534 = shalt.err (!%p2531_p10)
}
  0x1c   :  { %s2535_s1 = scalar_lea.vmem %s23_s16, 768  ;;  %p2540_p12 = scmp.lt.s32.totalorder %s23_s16, %s23_s16 }
  0x1d   :  { %p2536_p11 = scmp.ne.s32.totalorder %s23_s16, %s2535_s1  ;;  %p2541_p13 = scmp.lt.s32.totalorder %s2535_s1, %s2535_s1 }
  0x1f   :  { %p2542_p0 = por %p2541_p13, %p2540_p12 }
  0x21   :  { %p2543_p1 = pnand %p2542_p0, %p2536_p11 }
  0x23   :  { %2546 = shalt.err (!%p2543_p1)
}
  0x24   :  { %25 = dma.hbm_to_vmem [thread:$0]  %s2755_s0, 768, %s23_s16, [#allocation3]  }
  0x25   :  { %s2547_s30 = scalar_lea.hbm %s2758_s3, 6144 }
  0x26   :  { %p2548_p2 = scmp.ne.s32.totalorder %s2758_s3, %s2547_s30  ;;  %p2551_p3 = scmp.lt.u32.totalorder %s2547_s30, %s2758_s3 }
  0x28   :  { %p2553_p4 = pnand %p2551_p3, %p2548_p2 }
  0x2a   :  { %2556 = shalt.err (!%p2553_p4)
}
  0x2b   :  { %s2557_s12 = scalar_lea.vmem %s46_s18, 6144  ;;  %p2562_p6 = scmp.lt.s32.totalorder %s46_s18, %s46_s18 }
  0x2c   :  { %p2558_p5 = scmp.ne.s32.totalorder %s46_s18, %s2557_s12  ;;  %p2563_p7 = scmp.lt.s32.totalorder %s2557_s12, %s2557_s12 }
  0x2e   :  { %p2564_p8 = por %p2563_p7, %p2562_p6 }
  0x30   :  { %p2565_p9 = pnand %p2564_p8, %p2558_p5 }
  0x32   :  { %2568 = shalt.err (!%p2565_p9)
}
  0x33   :  { %s2626_s0 = smov 128   ;;  %s2627_s13 = smov 8  }
  0x34   :  { %51 = dma.hbm_to_vmem [thread:$0]  %s2758_s3, 6144, %s46_s18, [#allocation6], %s2626_s0, %s2626_s0, %s2627_s13  }
  0x35   :  { %s2628_s16 = smov [#allocation8]   ;;  %s2569_s21 = scalar_lea.hbm %s2760_s5, 2048 }
  0x36   :  { %s59_s17 = sshll.u32 %s2628_s16, 4  ;;  %p2570_p10 = scmp.ne.s32.totalorder %s2760_s5, %s2569_s21  ;;  %s60_s17 = int_to_ptr.vmem [resolvable:$true] %s59_s17 }
  0x37   :  { %p2573_p11 = scmp.lt.u32.totalorder %s2569_s21, %s2760_s5 }
  0x39   :  { %p2575_p12 = pnand %p2573_p11, %p2570_p10 }
  0x3b   :  { %2578 = shalt.err (!%p2575_p12)
}
  0x3c   :  { %s2579_s1 = scalar_lea.vmem %s60_s17, 2048  ;;  %p2584_p0 = scmp.lt.s32.totalorder %s60_s17, %s60_s17 }
  0x3d   :  { %p2580_p13 = scmp.ne.s32.totalorder %s60_s17, %s2579_s1  ;;  %p2585_p1 = scmp.lt.s32.totalorder %s2579_s1, %s2579_s1 }
  0x3f   :  { %p2586_p2 = por %p2585_p1, %p2584_p0 }
  0x41   :  { %p2587_p3 = pnand %p2586_p2, %p2580_p13 }
  0x43   :  { %2590 = shalt.err (!%p2587_p3)
}
  0x44   :  { %s2629_s3 = smov 64   ;;  %s2630_s18 = smov 4  }
  0x45   :  { %65 = dma.hbm_to_vmem [thread:$0]  %s2760_s5, 2048, %s60_s17, [#allocation9], %s2629_s3, %s2629_s3, %s2630_s18  }
  0x46   :  { %2613 = dma.done.wait [#allocation3], 768  }
  0x47   :  { %2614 = vsyncadd [#allocation3], 4294966528 }
  0x48   :  { %2615 = dma.done.wait [#allocation6], 24576  }
  0x49   :  { %2616 = vsyncadd [#allocation6], 4294942720 }
  0x4a   :  { %2617 = dma.done.wait [#allocation9], 2048  }
  0x4b   :  { %2618 = vsyncadd [#allocation9], 4294965248  ;;  %v2223_v0 = vld [vmem:[#allocation5 + $0x4] ss:$12 sps:$4 sm:$0xff]   ;;  %v2225_v1 = vld [vmem:[#allocation5] ss:$12 sps:$4 sm:$0xff]  }
  0x4c   :  { %1070 = vmatprep.subr.bf16.mxu0 %v2223_v0  ;;  %v2226_v2 = vld [vmem:[#allocation5 + $0x1c] ss:$12 sps:$4 sm:$0xff]   ;;  %v2228_v3 = vld [vmem:[#allocation5 + $0x18] ss:$12 sps:$4 sm:$0xff]   ;;  %v2229_v4 = vld [vmem:[#allocation5 + $0x34] ss:$12 sps:$4 sm:$0xff]  }
  0x4d   :  { %1071 = vmatpush1.bf16.msra.mxu0 %v2225_v1  ;;  %v2231_v5 = vld [vmem:[#allocation5 + $0x30] ss:$12 sps:$4 sm:$0xff]   ;;  %v2232_v6 = vld [vmem:[#allocation5 + $0x4c] ss:$12 sps:$4 sm:$0xff]   ;;  %v2234_v7 = vld [vmem:[#allocation5 + $0x48] ss:$12 sps:$4 sm:$0xff]  }
  0x4e   :  { %1072 = vmatprep.subr.bf16.mxu0 %v2226_v2  ;;  %v2235_v8 = vld [vmem:[#allocation5 + $0x64] ss:$12 sps:$4 sm:$0xff]   ;;  %v2237_v9 = vld [vmem:[#allocation5 + $0x60] ss:$12 sps:$4 sm:$0xff]   ;;  %v2238_v10 = vld [vmem:[#allocation5 + $0x7c] ss:$12 sps:$4 sm:$0xff]  }
  0x4f   :  { %v2240_v11 = vld [vmem:[#allocation5 + $0x78] ss:$12 sps:$4 sm:$0xff]   ;;  %v2241_v12 = vld [vmem:[#allocation5 + $0x94] ss:$12 sps:$4 sm:$0xff]   ;;  %v2243_v14 = vld [vmem:[#allocation5 + $0x90] ss:$12 sps:$4 sm:$0xff]  }
  0x50   :  { %v82_v13 = vld [vmem:[#allocation2 + $0x8] sm:$0xff]  ;;  %v2274_v17 = vld [vmem:[#allocation5 + $0xc8] ss:$12 sps:$4 sm:$0xff]   ;;  %v2247_v20 = vld [vmem:[#allocation5 + $0xc4] ss:$12 sps:$4 sm:$0xff]  }
  0x51   :  { %1073 = vmatpush1.bf16.msra.mxu0 %v2228_v3  ;;  %v88_v15 = vpack.c.bf16 %v82_v13, %v82_v13  ;;  %v2244_v16 = vld [vmem:[#allocation5 + $0xac] ss:$12 sps:$4 sm:$0xff]   ;;  %v2275_v18 = vld [vmem:[#allocation5 + $0x8] ss:$12 sps:$4 sm:$0xff]   ;;  %2107 = vmatprep.subr.bf16.mxu1 %v2274_v17  ;;  %v2289_v28 = vld [vmem:[#allocation5 + $0x110] ss:$12 sps:$4 sm:$0xff]  }
  0x52   :  { %1074 = vmatprep.subr.bf16.mxu0 %v2229_v4  ;;  %v2246_v19 = vld [vmem:[#allocation5 + $0xa8] ss:$12 sps:$4 sm:$0xff]   ;;  %2108 = vmatpush3.bf16.msra.mxu1 %v2275_v18  ;;  %v2279_v21 = vld [vmem:[#allocation5 + $0xe0] ss:$12 sps:$4 sm:$0xff]   ;;  %v2284_v24 = vld [vmem:[#allocation5 + $0xf8] ss:$12 sps:$4 sm:$0xff]  }
  0x53   :  { %1102 = vmatprep.mubr.bf16.mxu0 %v88_v15  ;;  %1225 = vmatprep.mubr.bf16.mxu1 %v88_v15  ;;  %v2280_v22 = vld [vmem:[#allocation5 + $0x20] ss:$12 sps:$4 sm:$0xff]   ;;  %v2285_v25 = vld [vmem:[#allocation5 + $0x38] ss:$12 sps:$4 sm:$0xff]   ;;  %v2250_v26 = vld [vmem:[#allocation5 + $0xdc] ss:$12 sps:$4 sm:$0xff]  }
  0x54   :  { %v2249_v23 = vld [vmem:[#allocation5 + $0xc0] ss:$12 sps:$4 sm:$0xff]   ;;  %2109 = vmatprep.subr.bf16.mxu1 %v2279_v21  ;;  %v2252_v27 = vld [vmem:[#allocation5 + $0xd8] ss:$12 sps:$4 sm:$0xff]   ;;  %v2290_v29 = vld [vmem:[#allocation5 + $0x50] ss:$12 sps:$4 sm:$0xff]  }
  0x55   :  { %1075 = vmatpush1.bf16.msra.mxu0 %v2231_v5  ;;  %v2253_v30 = vld [vmem:[#allocation5 + $0xf4] ss:$12 sps:$4 sm:$0xff]   ;;  %v2255_v32 = vld [vmem:[#allocation5 + $0xf0] ss:$12 sps:$4 sm:$0xff]   ;;  %v2256_v33 = vld [vmem:[#allocation5 + $0x10c] ss:$12 sps:$4 sm:$0xff]  }
  0x56   :  { %1076 = vmatprep.subr.bf16.mxu0 %v2232_v6  ;;  %2110 = vmatpush3.bf16.msra.mxu1 %v2280_v22  ;;  %v2294_v31 = vld [vmem:[#allocation5 + $0x128] ss:$12 sps:$4 sm:$0xff]   ;;  %v2299_v35 = vld [vmem:[#allocation5 + $0x140] ss:$12 sps:$4 sm:$0xff]   ;;  %v2259_v37 = vld [vmem:[#allocation5 + $0x124] ss:$12 sps:$4 sm:$0xff]  }
  0x57   :  { %2111 = vmatprep.subr.bf16.mxu1 %v2284_v24  ;;  %v2295_v34 = vld [vmem:[#allocation5 + $0x68] ss:$12 sps:$4 sm:$0xff]   ;;  %v2300_v38 = vld [vmem:[#allocation5 + $0x80] ss:$12 sps:$4 sm:$0xff]   ;;  %v2304_v39 = vld [vmem:[#allocation5 + $0x158] ss:$12 sps:$4 sm:$0xff]  }
  0x58   :  { %v2258_v36 = vld [vmem:[#allocation5 + $0x108] ss:$12 sps:$4 sm:$0xff]   ;;  %v2261_v40 = vld [vmem:[#allocation5 + $0x120] ss:$12 sps:$4 sm:$0xff]   ;;  %v2305_v42 = vld [vmem:[#allocation5 + $0x98] ss:$12 sps:$4 sm:$0xff]  }
  0x59   :  { %1077 = vmatpush1.bf16.msra.mxu0 %v2234_v7  ;;  %v2262_v41 = vld [vmem:[#allocation5 + $0x13c] ss:$12 sps:$4 sm:$0xff]   ;;  %v2264_v44 = vld [vmem:[#allocation5 + $0x138] ss:$12 sps:$4 sm:$0xff]   ;;  %v2265_v45 = vld [vmem:[#allocation5 + $0x154] ss:$12 sps:$4 sm:$0xff]  }
  0x5a   :  { %1078 = vmatprep.subr.bf16.mxu0 %v2235_v8  ;;  %2112 = vmatpush3.bf16.msra.mxu1 %v2285_v25  ;;  %v2309_v43 = vld [vmem:[#allocation5 + $0x170] ss:$12 sps:$4 sm:$0xff]   ;;  %v2314_v47 = vld [vmem:[#allocation5 + $0x248] ss:$12 sps:$4 sm:$0xff]   ;;  %v2268_v51 = vld [vmem:[#allocation5 + $0x16c] ss:$12 sps:$4 sm:$0xff]  }
  0x5b   :  { %2113 = vmatprep.subr.bf16.mxu1 %v2289_v28  ;;  %v2310_v46 = vld [vmem:[#allocation5 + $0xb0] ss:$12 sps:$4 sm:$0xff]   ;;  %v2315_v50 = vld [vmem:[#allocation5 + $0x188] ss:$12 sps:$4 sm:$0xff]   ;;  %v2319_v53 = vld [vmem:[#allocation5 + $0x260] ss:$12 sps:$4 sm:$0xff]  }
  0x5c   :  { %v81_v48 = vld [vmem:[#allocation2] sm:$0xff]  ;;  %v2320_v56 = vld [vmem:[#allocation5 + $0x1a0] ss:$12 sps:$4 sm:$0xff]   ;;  %v2324_v57 = vld [vmem:[#allocation5 + $0x278] ss:$12 sps:$4 sm:$0xff]  }
  0x5d   :  { %1079 = vmatpush1.bf16.msra.mxu0 %v2237_v9  ;;  %v2267_v49 = vld [vmem:[#allocation5 + $0x150] ss:$12 sps:$4 sm:$0xff]   ;;  %v87_v52 = vpack.c.bf16 %v81_v48, %v81_v48  ;;  %v2270_v54 = vld [vmem:[#allocation5 + $0x168] ss:$12 sps:$4 sm:$0xff]   ;;  %v2271_v58 = vld [vmem:[#allocation5 + $0x180] ss:$12 sps:$4 sm:$0xff]  }
  0x5e   :  { %1080 = vmatprep.subr.bf16.mxu0 %v2238_v10  ;;  %2114 = vmatpush3.bf16.msra.mxu1 %v2290_v29  ;;  %v2273_v55 = vld [vmem:[#allocation5 + $0x184] ss:$12 sps:$4 sm:$0xff]   ;;  %v2278_v59 = vld [vmem:[#allocation5 + $0x19c] ss:$12 sps:$4 sm:$0xff]   ;;  %v2283_v63 = vld [vmem:[#allocation5 + $0x1b4] ss:$12 sps:$4 sm:$0xff]  }
  0x5f   :  { %2115 = vmatprep.subr.bf16.mxu1 %v2294_v31  ;;  %v2325_v60 = vld [vmem:[#allocation5 + $0x1b8] ss:$12 sps:$4 sm:$0xff]   ;;  %v2329_v61 = vld [vmem:[#allocation5 + $0x290] ss:$12 sps:$4 sm:$0xff]   ;;  %v2334_v1 = vld [vmem:[#allocation5 + $0x2a8] ss:$12 sps:$4 sm:$0xff]  }
  0x60   :  { %v2276_v62 = vld [vmem:[#allocation5 + $0x198] ss:$12 sps:$4 sm:$0xff]   ;;  %v2330_v0 = vld [vmem:[#allocation5 + $0x1d0] ss:$12 sps:$4 sm:$0xff]   ;;  %v2335_v4 = vld [vmem:[#allocation5 + $0x1e8] ss:$12 sps:$4 sm:$0xff]  }
  0x61   :  { %1081 = vmatpush1.bf16.msra.mxu0 %v2240_v11  ;;  %v2281_v2 = vld [vmem:[#allocation5 + $0x1b0] ss:$12 sps:$4 sm:$0xff]   ;;  %v2288_v3 = vld [vmem:[#allocation5 + $0x1cc] ss:$12 sps:$4 sm:$0xff]   ;;  %v2286_v6 = vld [vmem:[#allocation5 + $0x1c8] ss:$12 sps:$4 sm:$0xff]  }
  0x62   :  { %1082 = vmatprep.subr.bf16.mxu0 %v2241_v12  ;;  %2116 = vmatpush3.bf16.msra.mxu1 %v2295_v34  ;;  %v2339_v5 = vld [vmem:[#allocation5 + $0x2c0] ss:$12 sps:$4 sm:$0xff]   ;;  %v2293_v9 = vld [vmem:[#allocation5 + $0x1e4] ss:$12 sps:$4 sm:$0xff]   ;;  %v2318_v31 = vld [vmem:[#allocation5 + $0x25c] ss:$12 sps:$4 sm:$0xff]  }
  0x63   :  { %2117 = vmatprep.subr.bf16.mxu1 %v2299_v35  ;;  %v2340_v7 = vld [vmem:[#allocation5 + $0x200] ss:$12 sps:$4 sm:$0xff]   ;;  %v2344_v10 = vld [vmem:[#allocation5 + $0x2d8] ss:$12 sps:$4 sm:$0xff]   ;;  %v2349_v15 = vld [vmem:[#allocation5 + $0x2f0] ss:$12 sps:$4 sm:$0xff]  }
  0x64   :  { %v84_v8 = vld [vmem:[#allocation2 + $0x18] sm:$0xff]  ;;  %v2345_v13 = vld [vmem:[#allocation5 + $0x218] ss:$12 sps:$4 sm:$0xff]   ;;  %v2303_v17 = vld [vmem:[#allocation5 + $0x214] ss:$12 sps:$4 sm:$0xff]  }
  0x65   :  { %1083 = vmatpush1.bf16.msra.mxu0 %v2243_v14  ;;  %v90_v11 = vpack.c.bf16 %v84_v8, %v84_v8  ;;  %v2291_v12 = vld [vmem:[#allocation5 + $0x1e0] ss:$12 sps:$4 sm:$0xff]   ;;  %v2298_v14 = vld [vmem:[#allocation5 + $0x1fc] ss:$12 sps:$4 sm:$0xff]   ;;  %v2364_v29 = vld [vmem:[#allocation5 + $0x3f8] ss:$12 sps:$4 sm:$0xff]  }
  0x66   :  { %1084 = vmatprep.subr.bf16.mxu0 %v2244_v16  ;;  %2118 = vmatpush3.bf16.msra.mxu1 %v2300_v38  ;;  %v2296_v16 = vld [vmem:[#allocation5 + $0x1f8] ss:$12 sps:$4 sm:$0xff]   ;;  %v2350_v18 = vld [vmem:[#allocation5 + $0x230] ss:$12 sps:$4 sm:$0xff]   ;;  %v2359_v25 = vld [vmem:[#allocation5 + $0x3e0] ss:$12 sps:$4 sm:$0xff]  }
  0x67   :  { %2119 = vmatprep.subr.bf16.mxu1 %v2304_v39  ;;  %v83_v21 = vld [vmem:[#allocation2 + $0x10] sm:$0xff]  ;;  %v2308_v22 = vld [vmem:[#allocation5 + $0x22c] ss:$12 sps:$4 sm:$0xff]   ;;  %v2370_v35 = vld [vmem:[#allocation5 + $0x350] ss:$12 sps:$4 sm:$0xff]  }
  0x68   :  { %v2721_v24 = vpack.c.bf16 %v83_v21, %v83_v21  ;;  %v2360_v28 = vld [vmem:[#allocation5 + $0x320] ss:$12 sps:$4 sm:$0xff]   ;;  %v2316_v34 = vld [vmem:[#allocation5 + $0x258] ss:$12 sps:$4 sm:$0xff]   ;;  %v2321_v38 = vld [vmem:[#allocation5 + $0x270] ss:$12 sps:$4 sm:$0xff]  }
  0x69   :  { %1085 = vmatpush1.bf16.msra.mxu0 %v2246_v19  ;;  %v2354_v19 = vld [vmem:[#allocation5 + $0x3c8] ss:$12 sps:$4 sm:$0xff]   ;;  %v2328_v39 = vld [vmem:[#allocation5 + $0x28c] ss:$12 sps:$4 sm:$0xff]   ;;  %v2381_v21 = vld [vmem:[#allocation5 + $0x390] ss:$12 sps:$4 sm:$0xff]  }
  0x6a   :  { %1086 = vmatprep.subr.bf16.mxu0 %v2247_v20  ;;  %2120 = vmatpush3.bf16.msra.mxu1 %v2305_v42  ;;  %v2301_v20 = vld [vmem:[#allocation5 + $0x210] ss:$12 sps:$4 sm:$0xff]   ;;  %v2331_v48 = vld [vmem:[#allocation5 + $0x2a0] ss:$12 sps:$4 sm:$0xff]  }
  0x6b   :  { %2121 = vmatprep.subr.bf16.mxu1 %v2309_v43  ;;  %v86_v42 = vld [vmem:[#allocation2 + $0x28] sm:$0xff] }
  0x6c   :  { %v92_v43 = vpack.c.bf16 %v86_v42, %v86_v42  ;;  %v2424_v8 = vld [vmem:[#allocation7 + $0x30] ss:$8 sps:$4 sm:$0xff]  }
  0x6d   :  { %1087 = vmatpush1.bf16.msra.mxu0 %v2249_v23  ;;  %v2355_v23 = vld [vmem:[#allocation5 + $0x308] ss:$12 sps:$4 sm:$0xff]   ;;  %v2436_v42 = vld [vmem:[#allocation7 + $0x70] ss:$8 sps:$4 sm:$0xff]  }
  0x6e   :  { %1088 = vmatprep.subr.bf16.mxu0 %v2250_v26  ;;  %2122 = vmatpush3.bf16.msra.mxu1 %v2310_v46  ;;  %v2306_v26 = vld [vmem:[#allocation5 + $0x228] ss:$12 sps:$4 sm:$0xff]   ;;  %v2333_v46 = vld [vmem:[#allocation5 + $0x2a4] ss:$12 sps:$4 sm:$0xff]  }
  0x6f   :  { %2129 = vmatprep.subr.bf16.mxu1 %v2314_v47  ;;  %v2384_v47 = vld [vmem:[#allocation5 + $0x458] ss:$12 sps:$4 sm:$0xff]  }
  0x71   :  { %1089 = vmatpush1.bf16.msra.mxu0 %v2252_v27  ;;  %1226 = vmatmul.mubr.bf16.vlgmr.msra.gmra.mrb[0].mxu1 %v87_v52  ;;  %v2313_v27 = vld [vmem:[#allocation5 + $0x244] ss:$12 sps:$4 sm:$0xff]  }
  0x72   :  { %1090 = vmatprep.subr.bf16.mxu0 %v2253_v30  ;;  %2130 = vmatpush3.bf16.msra.mxu1 %v2315_v50  ;;  %v2311_v30 = vld [vmem:[#allocation5 + $0x240] ss:$12 sps:$4 sm:$0xff]   ;;  %v2338_v50 = vld [vmem:[#allocation5 + $0x2bc] ss:$12 sps:$4 sm:$0xff]  }
  0x73   :  { %2131 = vmatprep.subr.bf16.mxu1 %v2319_v53  ;;  %1265 = vmatprep.mubr.bf16.mxu1 %v90_v11  ;;  %v2390_v53 = vld [vmem:[#allocation5 + $0x3b0] ss:$12 sps:$4 sm:$0xff]  }
  0x75   :  { %1091 = vmatpush1.bf16.msra.mxu0 %v2255_v32  ;;  %v2365_v32 = vld [vmem:[#allocation5 + $0x338] ss:$12 sps:$4 sm:$0xff]  }
  0x76   :  { %1092 = vmatprep.subr.bf16.mxu0 %v2256_v33  ;;  %2132 = vmatpush3.bf16.msra.mxu1 %v2320_v56  ;;  %v2369_v33 = vld [vmem:[#allocation5 + $0x410] ss:$12 sps:$4 sm:$0xff]   ;;  %v2417_v56 = vld [vmem:[#allocation7 + $0x4] ss:$8 sps:$4 sm:$0xff]  }
  0x77   :  { %2133 = vmatprep.subr.bf16.mxu1 %v2324_v57  ;;  %v2341_v57 = vld [vmem:[#allocation5 + $0x2d0] ss:$12 sps:$4 sm:$0xff]  }
  0x79   :  { %1093 = vmatpush1.bf16.msra.mxu0 %v2258_v36  ;;  %v2323_v36 = vld [vmem:[#allocation5 + $0x274] ss:$12 sps:$4 sm:$0xff]  }
  0x7a   :  { %1094 = vmatprep.subr.bf16.mxu0 %v2259_v37  ;;  %2134 = vmatpush3.bf16.msra.mxu1 %v2325_v60  ;;  %v2374_v37 = vld [vmem:[#allocation5 + $0x428] ss:$12 sps:$4 sm:$0xff]   ;;  %v2348_v60 = vld [vmem:[#allocation5 + $0x2ec] ss:$12 sps:$4 sm:$0xff]  }
  0x7b   :  { %2135 = vmatprep.subr.bf16.mxu1 %v2329_v61  ;;  %v2420_v61 = vld [vmem:[#allocation7 + $0x14] ss:$8 sps:$4 sm:$0xff]  }
  0x7d   :  { %1095 = vmatpush1.bf16.msra.mxu0 %v2261_v40  ;;  %v2375_v40 = vld [vmem:[#allocation5 + $0x368] ss:$12 sps:$4 sm:$0xff]  }
  0x7e   :  { %1096 = vmatprep.subr.bf16.mxu0 %v2262_v41  ;;  %2136 = vmatpush3.bf16.msra.mxu1 %v2330_v0  ;;  %v2379_v41 = vld [vmem:[#allocation5 + $0x440] ss:$12 sps:$4 sm:$0xff]   ;;  %v2353_v0 = vld [vmem:[#allocation5 + $0x304] ss:$12 sps:$4 sm:$0xff]  }
  0x7f   :  { %2137 = vmatprep.subr.bf16.mxu1 %v2334_v1  ;;  %v2423_v1 = vld [vmem:[#allocation7 + $0x24] ss:$8 sps:$4 sm:$0xff]  }
  0x81   :  { %1097 = vmatpush1.bf16.msra.mxu0 %v2264_v44  ;;  %v2326_v44 = vld [vmem:[#allocation5 + $0x288] ss:$12 sps:$4 sm:$0xff]  }
  0x82   :  { %1098 = vmatprep.subr.bf16.mxu0 %v2265_v45  ;;  %2138 = vmatpush3.bf16.msra.mxu1 %v2335_v4  ;;  %v2380_v45 = vld [vmem:[#allocation5 + $0x380] ss:$12 sps:$4 sm:$0xff]  }
  0x83   :  { %2139 = vmatprep.subr.bf16.mxu1 %v2339_v5  ;;  %v2421_v4 = vld [vmem:[#allocation7 + $0x20] ss:$8 sps:$4 sm:$0xff]   ;;  %v2426_v5 = vld [vmem:[#allocation7 + $0x34] ss:$8 sps:$4 sm:$0xff]  }
  0x85   :  { %1099 = vmatpush1.bf16.msra.mxu0 %v2267_v49  ;;  %v2385_v49 = vld [vmem:[#allocation5 + $0x398] ss:$12 sps:$4 sm:$0xff]  }
  0x86   :  { %1100 = vmatprep.subr.bf16.mxu0 %v2268_v51  ;;  %2140 = vmatpush3.bf16.msra.mxu1 %v2340_v7  ;;  %v2389_v51 = vld [vmem:[#allocation5 + $0x470] ss:$12 sps:$4 sm:$0xff]   ;;  %v2363_v7 = vld [vmem:[#allocation5 + $0x334] ss:$12 sps:$4 sm:$0xff]  }
  0x87   :  { %2141 = vmatprep.subr.bf16.mxu1 %v2344_v10  ;;  %v2361_v10 = vld [vmem:[#allocation5 + $0x330] ss:$12 sps:$4 sm:$0xff]  }
  0x89   :  { %1101 = vmatpush1.bf16.msra.mxu0 %v2270_v54  ;;  %v85_v54 = vld [vmem:[#allocation2 + $0x20] sm:$0xff] }
  0x8a   :  { %1111 = vmatprep.subr.bf16.mxu0 %v2273_v55  ;;  %2142 = vmatpush3.bf16.msra.mxu1 %v2345_v13  ;;  %v2343_v55 = vld [vmem:[#allocation5 + $0x2d4] ss:$12 sps:$4 sm:$0xff]  }
  0x8b   :  { %2143 = vmatprep.subr.bf16.mxu1 %v2349_v15  ;;  %v2366_v13 = vld [vmem:[#allocation5 + $0x348] ss:$12 sps:$4 sm:$0xff]   ;;  %v2371_v15 = vld [vmem:[#allocation5 + $0x360] ss:$12 sps:$4 sm:$0xff]  }
  0x8c   :  { %1103 = vmatmul.mubr.bf16.vlgmr.msra.gmra.mrb[0].mxu0 %v87_v52  ;;  %v2336_v52 = vld [vmem:[#allocation5 + $0x2b8] ss:$12 sps:$4 sm:$0xff]  }
  0x8d   :  { %1112 = vmatpush1.bf16.msra.mxu0 %v2271_v58  ;;  %1143 = vmatprep.mubr.bf16.mxu0 %v90_v11  ;;  %v2724_v58 = vpack.c.bf16 %v85_v54, %v85_v54  ;;  %v2368_v11 = vld [vmem:[#allocation5 + $0x34c] ss:$12 sps:$4 sm:$0xff]   ;;  %v2456_v54 = vld [vmem:[#allocation7 + $0xd4] ss:$8 sps:$4 sm:$0xff]  }
  0x8e   :  { %1113 = vmatprep.subr.bf16.mxu0 %v2278_v59  ;;  %2144 = vmatpush3.bf16.msra.mxu1 %v2350_v18  ;;  %v2415_v59 = vld [vmem:[#allocation7] ss:$8 sps:$4 sm:$0xff]   ;;  %v2432_v18 = vld [vmem:[#allocation7 + $0x54] ss:$8 sps:$4 sm:$0xff]  }
  0x8f   :  { %2151 = vmatprep.subr.bf16.mxu1 %v2354_v19  ;;  %v2376_v19 = vld [vmem:[#allocation5 + $0x378] ss:$12 sps:$4 sm:$0xff]  }
  0x91   :  { %1114 = vmatpush1.bf16.msra.mxu0 %v2276_v62  ;;  %1266 = vmatmul.mubr.bf16.vlgmr.msra.gmra.mrb[4].mxu1 %v2721_v24  ;;  %v2346_v62 = vld [vmem:[#allocation5 + $0x2e8] ss:$12 sps:$4 sm:$0xff]  }
  0x92   :  { %1115 = vmatprep.subr.bf16.mxu0 %v2283_v63  ;;  %2152 = vmatpush3.bf16.msra.mxu1 %v2355_v23  ;;  %v2418_v63 = vld [vmem:[#allocation7 + $0x10] ss:$8 sps:$4 sm:$0xff]   ;;  %v2386_v23 = vld [vmem:[#allocation5 + $0x3a8] ss:$12 sps:$4 sm:$0xff]  }
  0x93   :  { %2153 = vmatprep.subr.bf16.mxu1 %v2359_v25  ;;  %1305 = vmatprep.mubr.bf16.mxu1 %v92_v43  ;;  %v2391_v25 = vld [vmem:[#allocation5 + $0x3c0] ss:$12 sps:$4 sm:$0xff]  }
  0x95   :  { %1116 = vmatpush1.bf16.msra.mxu0 %v2281_v2  ;;  %v2351_v2 = vld [vmem:[#allocation5 + $0x300] ss:$12 sps:$4 sm:$0xff]  }
  0x96   :  { %1117 = vmatprep.subr.bf16.mxu0 %v2288_v3  ;;  %2154 = vmatpush3.bf16.msra.mxu1 %v2360_v28  ;;  %v2358_v3 = vld [vmem:[#allocation5 + $0x31c] ss:$12 sps:$4 sm:$0xff]   ;;  %v2399_v28 = vld [vmem:[#allocation5 + $0x3f4] ss:$12 sps:$4 sm:$0xff]  }
  0x97   :  { %2155 = vmatprep.subr.bf16.mxu1 %v2364_v29  ;;  %v2397_v29 = vld [vmem:[#allocation5 + $0x3f0] ss:$12 sps:$4 sm:$0xff]  }
  0x99   :  { %1118 = vmatpush1.bf16.msra.mxu0 %v2286_v6  ;;  %v2356_v6 = vld [vmem:[#allocation5 + $0x318] ss:$12 sps:$4 sm:$0xff]  }
  0x9a   :  { %1119 = vmatprep.subr.bf16.mxu0 %v2293_v9  ;;  %2156 = vmatpush3.bf16.msra.mxu1 %v2365_v32  ;;  %v2429_v9 = vld [vmem:[#allocation7 + $0x44] ss:$8 sps:$4 sm:$0xff]  }
  0x9b   :  { %2157 = vmatprep.subr.bf16.mxu1 %v2369_v33  ;;  %v2405_v32 = vld [vmem:[#allocation5 + $0x424] ss:$12 sps:$4 sm:$0xff]   ;;  %v2403_v33 = vld [vmem:[#allocation5 + $0x420] ss:$12 sps:$4 sm:$0xff]  }
  0x9d   :  { %1120 = vmatpush1.bf16.msra.mxu0 %v2291_v12  ;;  %v2427_v12 = vld [vmem:[#allocation7 + $0x40] ss:$8 sps:$4 sm:$0xff]  }
  0x9e   :  { %1121 = vmatprep.subr.bf16.mxu0 %v2298_v14  ;;  %2158 = vmatpush3.bf16.msra.mxu1 %v2370_v35  ;;  %v2373_v14 = vld [vmem:[#allocation5 + $0x364] ss:$12 sps:$4 sm:$0xff]   ;;  %v2433_v35 = vld [vmem:[#allocation7 + $0x60] ss:$8 sps:$4 sm:$0xff]  }
  0x9f   :  { %2159 = vmatprep.subr.bf16.mxu1 %v2374_v37  ;;  %v2406_v37 = vld [vmem:[#allocation5 + $0x438] ss:$12 sps:$4 sm:$0xff]  }
  0xa1   :  { %1122 = vmatpush1.bf16.msra.mxu0 %v2296_v16  ;;  %v2378_v16 = vld [vmem:[#allocation5 + $0x37c] ss:$12 sps:$4 sm:$0xff]  }
  0xa2   :  { %1123 = vmatprep.subr.bf16.mxu0 %v2303_v17  ;;  %2160 = vmatpush3.bf16.msra.mxu1 %v2375_v40  ;;  %v2430_v17 = vld [vmem:[#allocation7 + $0x50] ss:$8 sps:$4 sm:$0xff]  }
  0xa3   :  { %2161 = vmatprep.subr.bf16.mxu1 %v2379_v41  ;;  %v2414_v40 = vld [vmem:[#allocation5 + $0x46c] ss:$12 sps:$4 sm:$0xff]   ;;  %v2412_v41 = vld [vmem:[#allocation5 + $0x468] ss:$12 sps:$4 sm:$0xff]  }
  0xa5   :  { %1124 = vmatpush1.bf16.msra.mxu0 %v2301_v20  ;;  %v2383_v20 = vld [vmem:[#allocation5 + $0x394] ss:$12 sps:$4 sm:$0xff]  }
  0xa6   :  { %1125 = vmatprep.subr.bf16.mxu0 %v2308_v22  ;;  %2162 = vmatpush3.bf16.msra.mxu1 %v2380_v45  ;;  %v2388_v22 = vld [vmem:[#allocation5 + $0x3ac] ss:$12 sps:$4 sm:$0xff]   ;;  %v2439_v45 = vld [vmem:[#allocation7 + $0x80] ss:$8 sps:$4 sm:$0xff]  }
  0xa7   :  { %2163 = vmatprep.subr.bf16.mxu1 %v2384_v47  ;;  %v2442_v47 = vld [vmem:[#allocation7 + $0x90] ss:$8 sps:$4 sm:$0xff]  }
  0xa9   :  { %1126 = vmatpush1.bf16.msra.mxu0 %v2306_v26  ;;  %v2396_v26 = vld [vmem:[#allocation5 + $0x3dc] ss:$12 sps:$4 sm:$0xff]  }
  0xaa   :  { %1127 = vmatprep.subr.bf16.mxu0 %v2313_v27  ;;  %2164 = vmatpush3.bf16.msra.mxu1 %v2385_v49  ;;  %v2394_v27 = vld [vmem:[#allocation5 + $0x3d8] ss:$12 sps:$4 sm:$0xff]   ;;  %v2445_v49 = vld [vmem:[#allocation7 + $0xa0] ss:$8 sps:$4 sm:$0xff]  }
  0xab   :  { %2165 = vmatprep.subr.bf16.mxu1 %v2389_v51  ;;  %v2448_v51 = vld [vmem:[#allocation7 + $0xb0] ss:$8 sps:$4 sm:$0xff]  }
  0xad   :  { %1128 = vmatpush1.bf16.msra.mxu0 %v2311_v30  ;;  %v2402_v30 = vld [vmem:[#allocation5 + $0x40c] ss:$12 sps:$4 sm:$0xff]  }
  0xae   :  { %1129 = vmatprep.subr.bf16.mxu0 %v2318_v31  ;;  %2166 = vmatpush3.bf16.msra.mxu1 %v2390_v53  ;;  %v2400_v31 = vld [vmem:[#allocation5 + $0x408] ss:$12 sps:$4 sm:$0xff]  }
  0xaf   :  { %1619 = vmatprep.subr.bf16.mxu1 %v2417_v56  ;;  %v2451_v53 = vld [vmem:[#allocation7 + $0xc0] ss:$8 sps:$4 sm:$0xff]  }
  0xb1   :  { %1130 = vmatpush1.bf16.msra.mxu0 %v2316_v34  ;;  %1306 = vmatmul.mubr.bf16.vlgmr.msra.gmra.mrb[8].mxu1 %v2724_v58  ;;  %v2408_v34 = vld [vmem:[#allocation5 + $0x43c] ss:$12 sps:$4 sm:$0xff]  }
  0xb2   :  { %1131 = vmatprep.subr.bf16.mxu0 %v2323_v36  ;;  %1620 = vmatpush1.bf16.msra.mxu1 %v2415_v59  ;;  %v2435_v36 = vld [vmem:[#allocation7 + $0x64] ss:$8 sps:$4 sm:$0xff]  }
  0xb3   :  { %1621 = vmatprep.subr.bf16.mxu1 %v2420_v61  ;;  %v2459_v61 = vld [vmem:[#allocation7 + $0xe4] ss:$8 sps:$4 sm:$0xff]  }
  0xb5   :  { %1132 = vmatpush1.bf16.msra.mxu0 %v2321_v38  ;;  %v2411_v38 = vld [vmem:[#allocation5 + $0x454] ss:$12 sps:$4 sm:$0xff]  }
  0xb6   :  { %1133 = vmatprep.subr.bf16.mxu0 %v2328_v39  ;;  %1622 = vmatpush1.bf16.msra.mxu1 %v2418_v63  ;;  %v2409_v39 = vld [vmem:[#allocation5 + $0x450] ss:$12 sps:$4 sm:$0xff]  }
  0xb7   :  { %1623 = vmatprep.subr.bf16.mxu1 %v2423_v1  ;;  %v2462_v63 = vld [vmem:[#allocation7 + $0xf4] ss:$8 sps:$4 sm:$0xff]   ;;  %v2465_v1 = vld [vmem:[#allocation7 + $0x104] ss:$8 sps:$4 sm:$0xff]  }
  0xb9   :  { %1134 = vmatpush1.bf16.msra.mxu0 %v2326_v44  ;;  %v2441_v44 = vld [vmem:[#allocation7 + $0x84] ss:$8 sps:$4 sm:$0xff]  }
  0xba   :  { %1135 = vmatprep.subr.bf16.mxu0 %v2333_v46  ;;  %1624 = vmatpush1.bf16.msra.mxu1 %v2421_v4  ;;  %v2444_v46 = vld [vmem:[#allocation7 + $0x94] ss:$8 sps:$4 sm:$0xff]  }
  0xbb   :  { %1625 = vmatprep.subr.bf16.mxu1 %v2426_v5  ;;  %v285_v5 = vld [vmem:[%s2757_s2] sm:$0x7] }
  0xbd   :  { %1136 = vmatpush1.bf16.msra.mxu0 %v2331_v48  ;;  %v2447_v48 = vld [vmem:[#allocation7 + $0xa4] ss:$8 sps:$4 sm:$0xff]  }
  0xbe   :  { %1137 = vmatprep.subr.bf16.mxu0 %v2338_v50  ;;  %1626 = vmatpush1.bf16.msra.mxu1 %v2424_v8  ;;  %v2450_v50 = vld [vmem:[#allocation7 + $0xb4] ss:$8 sps:$4 sm:$0xff]  }
  0xbf   :  { %1627 = vmatprep.subr.bf16.mxu1 %v2429_v9 }
  0xc1   :  { %1138 = vmatpush1.bf16.msra.mxu0 %v2336_v52  ;;  %v2453_v52 = vld [vmem:[#allocation7 + $0xc4] ss:$8 sps:$4 sm:$0xff]  }
  0xc2   :  { %1139 = vmatprep.subr.bf16.mxu0 %v2343_v55  ;;  %1628 = vmatpush1.bf16.msra.mxu1 %v2427_v12  ;;  %v2454_v55 = vld [vmem:[#allocation7 + $0xd0] ss:$8 sps:$4 sm:$0xff]  }
  0xc3   :  { %1629 = vmatprep.subr.bf16.mxu1 %v2432_v18  ;;  %v2491_v18 = vld [vmem:[#allocation8 + $0x50] sm:$0xff]  }
  0xc5   :  { %1140 = vmatpush1.bf16.msra.mxu0 %v2341_v57 }
  0xc6   :  { %1141 = vmatprep.subr.bf16.mxu0 %v2348_v60  ;;  %1630 = vmatpush1.bf16.msra.mxu1 %v2430_v17  ;;  %v2490_v17 = vld [vmem:[#allocation8 + $0x8] sm:$0xff]  }
  0xc7   :  { %1631 = vmatprep.subr.bf16.mxu1 %v2435_v36 }
  0xc9   :  { %1142 = vmatpush1.bf16.msra.mxu0 %v2346_v62  ;;  %v2457_v62 = vld [vmem:[#allocation7 + $0xe0] ss:$8 sps:$4 sm:$0xff]  }
  0xca   :  { %1152 = vmatprep.subr.bf16.mxu0 %v2353_v0  ;;  %1632 = vmatpush1.bf16.msra.mxu1 %v2433_v35  ;;  %v2460_v0 = vld [vmem:[#allocation7 + $0xf0] ss:$8 sps:$4 sm:$0xff]  }
  0xcc   :  { %1144 = vmatmul.mubr.bf16.vlgmr.msra.gmra.mrb[0].mxu0 %v2721_v24  ;;  %v2393_v24 = vld [vmem:[#allocation5 + $0x3c4] ss:$12 sps:$4 sm:$0xff]  }
  0xcd   :  { %1153 = vmatpush1.bf16.msra.mxu0 %v2351_v2  ;;  %1184 = vmatprep.mubr.bf16.mxu0 %v92_v43  ;;  %v2438_v43 = vld [vmem:[#allocation7 + $0x74] ss:$8 sps:$4 sm:$0xff]   ;;  %v287_v2 = vlaneseq }
  0xce   :  { %1154 = vmatprep.subr.bf16.mxu0 %v2358_v3  ;;  %1633 = vmatprep.subr.bf16.mxu1 %v2438_v43 }
  0xcf   :  { %1634 = vmatpush1.bf16.msra.mxu1 %v2436_v42  ;;  %v2729_v3 = vshrl.u32 %v287_v2, 7  ;;  %v2501_v2 = vld [vmem:[#allocation8 + $0x78] sm:$0xff]  }
  0xd0   :  { %1635 = vmatprep.subr.bf16.mxu1 %v2441_v44 }
  0xd1   :  { %1155 = vmatpush1.bf16.msra.mxu0 %v2356_v6  ;;  %v297_v4 = vsub.s32 2, %v2729_v3 }
  0xd2   :  { %1156 = vmatprep.subr.bf16.mxu0 %v2363_v7 }
  0xd3   :  { %1636 = vmatpush1.bf16.msra.mxu1 %v2439_v45  ;;  %v298_v6 = vrot.slane %v285_v5, %v297_v4  ;;  %v2463_v45 = vld [vmem:[#allocation7 + $0x100] ss:$8 sps:$4 sm:$0xff]   ;;  %v1367_v4 = vld [vmem:[%s2759_s4] sm:$0x3]  ;;  %s2632_s4 = smov [#allocation10]  }
  0xd4   :  { %1637 = vmatprep.subr.bf16.mxu1 %v2444_v46  ;;  %s1887_s9 = sshll.u32 %s2632_s4, 4  ;;  %s1888_s9 = int_to_ptr.vmem [resolvable:$true] %s1887_s9 }
  0xd5   :  { %1157 = vmatpush1.bf16.msra.mxu0 %v2361_v10  ;;  %s2591_s10 = scalar_lea.vmem %s1888_s9, 128  ;;  %p2596_p5 = scmp.lt.s32.totalorder %s1888_s9, %s1888_s9 }
  0xd6   :  { %1158 = vmatprep.subr.bf16.mxu0 %v2368_v11  ;;  %p2592_p4 = scmp.ne.s32.totalorder %s1888_s9, %s2591_s10  ;;  %p2597_p6 = scmp.lt.s32.totalorder %s2591_s10, %s2591_s10 }
  0xd7   :  { %1638 = vmatpush1.bf16.msra.mxu1 %v2442_v47  ;;  %v2468_v47 = vld [vmem:[#allocation7 + $0x114] ss:$8 sps:$4 sm:$0xff]  }
  0xd8   :  { %1639 = vmatprep.subr.bf16.mxu1 %v2447_v48  ;;  %v2466_v48 = vld [vmem:[#allocation7 + $0x110] ss:$8 sps:$4 sm:$0xff]   ;;  %p2598_p7 = por %p2597_p6, %p2596_p5 }
  0xd9   :  { %1159 = vmatpush1.bf16.msra.mxu0 %v2366_v13 }
  0xda   :  { %1160 = vmatprep.subr.bf16.mxu0 %v2373_v14  ;;  %v2487_v14 = vld [vmem:[#allocation8 + $0x40] sm:$0xff]   ;;  %p2599_p8 = pnand %p2598_p7, %p2592_p4 }
  0xdb   :  { %1640 = vmatpush1.bf16.msra.mxu1 %v2445_v49  ;;  %v2631_v49 = vmov 0  }
  0xdc   :  { %1641 = vmatprep.subr.bf16.mxu1 %v2450_v50  ;;  %v2471_v50 = vld [vmem:[#allocation7 + $0x124] ss:$8 sps:$4 sm:$0xff]  }
  0xdd   :  { %1161 = vmatpush1.bf16.msra.mxu0 %v2371_v15  ;;  %v2488_v15 = vld [vmem:[#allocation8] sm:$0xff]  }
  0xde   :  { %1162 = vmatprep.subr.bf16.mxu0 %v2378_v16  ;;  %v2489_v16 = vld [vmem:[#allocation8 + $0x48] sm:$0xff]  }
  0xdf   :  { %1642 = vmatpush1.bf16.msra.mxu1 %v2448_v51  ;;  %v2469_v51 = vld [vmem:[#allocation7 + $0x120] ss:$8 sps:$4 sm:$0xff]  }
  0xe0   :  { %1643 = vmatprep.subr.bf16.mxu1 %v2453_v52  ;;  %v2474_v52 = vld [vmem:[#allocation7 + $0x134] ss:$8 sps:$4 sm:$0xff]  }
  0xe1   :  { %1163 = vmatpush1.bf16.msra.mxu0 %v2376_v19  ;;  %v2492_v19 = vld [vmem:[#allocation8 + $0x10] sm:$0xff]  }
  0xe2   :  { %1164 = vmatprep.subr.bf16.mxu0 %v2383_v20  ;;  %v2493_v20 = vld [vmem:[#allocation8 + $0x58] sm:$0xff]  }
  0xe3   :  { %1644 = vmatpush1.bf16.msra.mxu1 %v2451_v53  ;;  %v2472_v53 = vld [vmem:[#allocation7 + $0x130] ss:$8 sps:$4 sm:$0xff]  }
  0xe4   :  { %1645 = vmatprep.subr.bf16.mxu1 %v2456_v54  ;;  %v2477_v54 = vld [vmem:[#allocation7 + $0x144] ss:$8 sps:$4 sm:$0xff]  }
  0xe5   :  { %1165 = vmatpush1.bf16.msra.mxu0 %v2381_v21  ;;  %v2494_v21 = vld [vmem:[#allocation8 + $0x18] sm:$0xff]  }
  0xe6   :  { %1166 = vmatprep.subr.bf16.mxu0 %v2388_v22  ;;  %v2495_v22 = vld [vmem:[#allocation8 + $0x60] sm:$0xff]  }
  0xe7   :  { %1646 = vmatpush1.bf16.msra.mxu1 %v2454_v55  ;;  %v2475_v55 = vld [vmem:[#allocation7 + $0x140] ss:$8 sps:$4 sm:$0xff]  }
  0xe8   :  { %1647 = vmatprep.subr.bf16.mxu1 %v2459_v61  ;;  %v2484_v61 = vld [vmem:[#allocation7 + $0x170] ss:$8 sps:$4 sm:$0xff]  }
  0xe9   :  { %1167 = vmatpush1.bf16.msra.mxu0 %v2386_v23 }
  0xea   :  { %1168 = vmatprep.subr.bf16.mxu0 %v2393_v24  ;;  %v2496_v24 = vld [vmem:[#allocation8 + $0x20] sm:$0xff]  }
  0xeb   :  { %1648 = vmatpush1.bf16.msra.mxu1 %v2457_v62 }
  0xec   :  { %1649 = vmatprep.subr.bf16.mxu1 %v2462_v63 }
  0xed   :  { %1169 = vmatpush1.bf16.msra.mxu0 %v2391_v25 }
  0xee   :  { %1170 = vmatprep.subr.bf16.mxu0 %v2396_v26  ;;  %v2497_v26 = vld [vmem:[#allocation8 + $0x68] sm:$0xff]  }
  0xef   :  { %1650 = vmatpush1.bf16.msra.mxu1 %v2460_v0  ;;  %v2499_v0 = vld [vmem:[#allocation8 + $0x70] sm:$0xff]  }
  0xf0   :  { %1660 = vmatprep.subr.bf16.mxu1 %v2465_v1  ;;  %v2500_v1 = vld [vmem:[#allocation8 + $0x30] sm:$0xff]  }
  0xf1   :  { %1171 = vmatpush1.bf16.msra.mxu0 %v2394_v27 }
  0xf2   :  { %1172 = vmatprep.subr.bf16.mxu0 %v2399_v28 }
  0xf5   :  { %1173 = vmatpush1.bf16.msra.mxu0 %v2397_v29 }
  0xf6   :  { %1174 = vmatprep.subr.bf16.mxu0 %v2402_v30 }
  0xf9   :  { %1175 = vmatpush1.bf16.msra.mxu0 %v2400_v31  ;;  %v2498_v31 = vld [vmem:[#allocation8 + $0x28] sm:$0xff]  }
  0xfa   :  { %1176 = vmatprep.subr.bf16.mxu0 %v2405_v32  ;;  %v289_v32 = vsub.s32 0, %v2729_v3 }
  0xfd   :  { %1177 = vmatpush1.bf16.msra.mxu0 %v2403_v33  ;;  %v293_v33 = vsub.s32 1, %v2729_v3  ;;  %v2502_v3 = vld [vmem:[#allocation8 + $0x38] sm:$0xff]  }
  0xfe   :  { %1178 = vmatprep.subr.bf16.mxu0 %v2408_v34  ;;  %v290_v34 = vrot.slane %v285_v5, %v289_v32 }
  0xff   :  { %v294_v35 = vrot.slane %v285_v5, %v293_v33  ;;  %v1372_v5 = vrot.slane %v1367_v4, %v289_v32 }
 0x101   :  { %1179 = vmatpush1.bf16.msra.mxu0 %v2406_v37 }
 0x102   :  { %1180 = vmatprep.subr.bf16.mxu0 %v2411_v38 }
 0x105   :  { %1181 = vmatpush1.bf16.msra.mxu0 %v2409_v39 }
 0x106   :  { %1182 = vmatprep.subr.bf16.mxu0 %v2414_v40 }
 0x109   :  { %1183 = vmatpush1.bf16.msra.mxu0 %v2412_v41 }
 0x10a   :  { %2173 = vmatprep.subr.bf16.mxu0 %v2487_v14 }
 0x10c   :  { %1185 = vmatmul.mubr.bf16.vlgmr.msra.gmra.mrb[0].mxu0 %v2724_v58 }
 0x10d   :  { %2174 = vmatpush3.bf16.msra.mxu0 %v2488_v15 }
 0x10e   :  { %2175 = vmatprep.subr.bf16.mxu0 %v2489_v16 }
 0x111   :  { %2176 = vmatpush3.bf16.msra.mxu0 %v2490_v17 }
 0x112   :  { %2177 = vmatprep.subr.bf16.mxu0 %v2491_v18  ;;  %v2090_v18 = vld [vmem:[%s2761_s6] ss:$0 sm:$0xff] }
 0x115   :  { %2178 = vmatpush3.bf16.msra.mxu0 %v2492_v19 }
 0x116   :  { %2179 = vmatprep.subr.bf16.mxu0 %v2493_v20 }
 0x119   :  { %2180 = vmatpush3.bf16.msra.mxu0 %v2494_v21 }
 0x11a   :  { %2181 = vmatprep.subr.bf16.mxu0 %v2495_v22 }
 0x11d   :  { %2182 = vmatpush3.bf16.msra.mxu0 %v2496_v24 }
 0x11e   :  { %2183 = vmatprep.subr.bf16.mxu0 %v2497_v26 }
 0x121   :  { %2184 = vmatpush3.bf16.msra.mxu0 %v2498_v31 }
 0x122   :  { %2185 = vmatprep.subr.bf16.mxu0 %v2499_v0 }
 0x125   :  { %2186 = vmatpush3.bf16.msra.mxu0 %v2500_v1 }
 0x126   :  { %2187 = vmatprep.subr.bf16.mxu0 %v2501_v2 }
 0x129   :  { %2188 = vmatpush3.bf16.msra.mxu0 %v2502_v3 }
 0x144   :  { %v2123_v56 = vpop.f32.mrb[0].mxu1 }
 0x145   :  { %v2124_v57 = vpop.f32.mrb[1].mxu1 }
 0x146   :  { %v2125_v58 = vadd.f32 %v2124_v57, %v2123_v56  ;;  %v2126_v59 = vpop.f32.mrb[2].mxu1  ;;  %v2480_v56 = vld [vmem:[#allocation7 + $0x154] ss:$8 sps:$4 sm:$0xff]   ;;  %v2478_v57 = vld [vmem:[#allocation7 + $0x150] ss:$8 sps:$4 sm:$0xff]  }
 0x147   :  { %v2127_v60 = vpop.f32.mrb[3].mxu1  ;;  %v2481_v59 = vld [vmem:[#allocation7 + $0x160] ss:$8 sps:$4 sm:$0xff]  }
 0x148   :  { %v1228_v7 = vadd.f32 %v2125_v58, %v298_v6  ;;  %v2483_v58 = vld [vmem:[#allocation7 + $0x164] ss:$8 sps:$4 sm:$0xff]   ;;  %v2486_v60 = vld [vmem:[#allocation7 + $0x174] ss:$8 sps:$4 sm:$0xff]   ;;  %v1376_v6 = vrot.slane %v1367_v4, %v293_v33 }
 0x164   :  { %v2145_v8 = vpop.f32.mrb[4].mxu1 }
 0x165   :  { %v2146_v9 = vpop.f32.mrb[5].mxu1 }
 0x166   :  { %v2147_v10 = vadd.f32 %v2146_v9, %v2145_v8  ;;  %v2148_v11 = vpop.f32.mrb[6].mxu1 }
 0x167   :  { %v2149_v12 = vpop.f32.mrb[7].mxu1 }
 0x168   :  { %v1268_v13 = vadd.f32 %v2147_v10, %v1228_v7 }
 0x184   :  { %v2167_v23 = vpop.f32.mrb[8].mxu1 }
 0x185   :  { %v2168_v25 = vpop.f32.mrb[9].mxu1 }
 0x186   :  { %v2169_v27 = vadd.f32 %v2168_v25, %v2167_v23  ;;  %v2170_v28 = vpop.f32.mrb[10].mxu1 }
 0x187   :  { %v2171_v29 = vpop.f32.mrb[11].mxu1 }
 0x188   :  { %v1308_v30 = vadd.f32 %v2169_v27, %v1268_v13 }
 0x18a   :  { %v1315_v62 = vmax.f32 %v1308_v30, 0.0 }
 0x18c   :  { %v1318_v63 = vpack.c.bf16 %v1315_v62, %v1315_v62 }
 0x1df   :  { %v1186_v36 = vpop.f32.mrb[0].mxu0 }
 0x1e0   :  { %v2195_v37 = vadd.f32 %v1186_v36, %v290_v34  ;;  %v1188_v38 = vpop.f32.mrb[1].mxu0 }
 0x1e1   :  { %v2196_v39 = vadd.f32 %v1188_v38, %v294_v35  ;;  %v1190_v40 = vpop.f32.mrb[2].mxu0 }
 0x1e2   :  { %v1313_v41 = vmax.f32 %v2195_v37, 0.0  ;;  %v1191_v42 = vpop.f32.mrb[3].mxu0 }
 0x1e3   :  { %v1314_v43 = vmax.f32 %v2196_v39, 0.0 }
 0x1e4   :  { %v1316_v46 = vpack.c.bf16 %v1313_v41, %v1313_v41 }
 0x1e5   :  { %v1317_v44 = vpack.c.bf16 %v1314_v43, %v1314_v43 }
 0x1e7   :  { %1651 = vmatprep.mubr.bf16.mxu1 %v1317_v44 }
 0x1e8   :  { %1652 = vmatmul.mubr.bf16.vlgmr.msra.gmra.mrb[12].mxu1 %v1316_v46 }
 0x1e9   :  { %1661 = vmatpush1.bf16.msra.mxu1 %v2463_v45  ;;  %1692 = vmatprep.mubr.bf16.mxu1 %v2631_v49 }
 0x1ea   :  { %1662 = vmatprep.subr.bf16.mxu1 %v2468_v47 }
 0x1ed   :  { %1663 = vmatpush1.bf16.msra.mxu1 %v2466_v48 }
 0x1ee   :  { %1664 = vmatprep.subr.bf16.mxu1 %v2471_v50 }
 0x1f1   :  { %1665 = vmatpush1.bf16.msra.mxu1 %v2469_v51 }
 0x1f2   :  { %1666 = vmatprep.subr.bf16.mxu1 %v2474_v52 }
 0x1f5   :  { %1667 = vmatpush1.bf16.msra.mxu1 %v2472_v53 }
 0x1f6   :  { %1668 = vmatprep.subr.bf16.mxu1 %v2477_v54 }
 0x1f9   :  { %1669 = vmatpush1.bf16.msra.mxu1 %v2475_v55 }
 0x1fa   :  { %1670 = vmatprep.subr.bf16.mxu1 %v2480_v56 }
 0x1fd   :  { %1671 = vmatpush1.bf16.msra.mxu1 %v2478_v57 }
 0x1fe   :  { %1672 = vmatprep.subr.bf16.mxu1 %v2483_v58 }
 0x201   :  { %1673 = vmatpush1.bf16.msra.mxu1 %v2481_v59 }
 0x202   :  { %1674 = vmatprep.subr.bf16.mxu1 %v2486_v60 }
 0x205   :  { %1675 = vmatpush1.bf16.msra.mxu1 %v2484_v61 }
 0x208   :  { %1693 = vmatmul.mubr.bf16.vlgmr.msra.gmra.mrb[12].mxu1 %v1318_v63 }
 0x2db   :  { %v1694_v7 = vpop.f32.mrb[12].mxu1 }
 0x2dc   :  { %v2197_v8 = vadd.f32 %v1694_v7, %v1372_v5  ;;  %v1696_v9 = vpop.f32.mrb[13].mxu1 }
 0x2dd   :  { %v2198_v10 = vadd.f32 %v1696_v9, %v1376_v6  ;;  %v1698_v11 = vpop.f32.mrb[14].mxu1 }
 0x2de   :  { %v1701_v12 = vmax.f32 %v2197_v8, 0.0  ;;  %v1699_v13 = vpop.f32.mrb[15].mxu1 }
 0x2df   :  { %v1702_v14 = vmax.f32 %v2198_v10, 0.0 }
 0x2e0   :  { %v1703_v16 = vpack.c.bf16 %v1701_v12, %v1701_v12 }
 0x2e1   :  { %v1704_v15 = vpack.c.bf16 %v1702_v14, %v1702_v14 }
 0x2e3   :  { %1872 = vmatprep.mubr.bf16.mxu0 %v1704_v15 }
 0x2e4   :  { %1873 = vmatmul.mubr.bf16.vlgmr.msra.gmra.mrb[4].mxu0 %v1703_v16 }
 0x3b7   :  { %v2189_v17 = vpop.f32.mrb[4].mxu0 }
 0x3b8   :  { %v2190_v19 = vpop.f32.mrb[5].mxu0 }
 0x3b9   :  { %v2191_v20 = vadd.f32 %v2190_v19, %v2189_v17  ;;  %v2192_v21 = vpop.f32.mrb[6].mxu0 }
 0x3ba   :  { %v2193_v22 = vpop.f32.mrb[7].mxu0 }
 0x3bb   :  { %v1875_v23 = vadd.f32 %v2191_v20, %v2090_v18 }
 0x3bd   :  { %1880 = vst [vmem:[#allocation10] sm:$0xff] %v1875_v23 }
 0x3be   :  { %2602 = shalt.err (!%p2599_p8)
}
 0x3bf   :  { %s2603_s6 = scalar_lea.hbm %s2762_s7, 128 }
 0x3c0   :  { %p2604_p9 = scmp.ne.s32.totalorder %s2762_s7, %s2603_s6  ;;  %p2607_p10 = scmp.lt.u32.totalorder %s2603_s6, %s2762_s7 }
 0x3c2   :  { %p2609_p11 = pnand %p2607_p10, %p2604_p9 }
 0x3c4   :  { %2612 = shalt.err (!%p2609_p11)
}
 0x3c5   :  { %1890 = dma.vmem_to_hbm [thread:$0]  %s1888_s9, 128, %s2762_s7, [#allocation4]  }
 0x3c6   :  { %2619 = dma.done.wait [#allocation4], 128  }
 0x3c7   :  { %2620 = vsyncadd [#allocation4], 4294967168 }
 0x3c8   :  { %1894 = vsyncpa [#allocation3], 1 }
 0x3c9   :  { %1895 = vsyncpa [#allocation6], 1 }
 0x3ca   :  { %1896 = vsyncpa [#allocation9], 1 }
 0x3cb   :  { %1897 = vsyncpa [#allocation4], 1 }

</bundles_post_ra>
